<compile_context>
chip_gen: v5e
topology: v5e:2x2
jax: 0.10.0
libtpu: 0.0.40
codegen_flags: <defaults>
</compile_context>

<pallas_src>
import functools
import math

import jax
import jax.numpy as jnp
from jax.experimental import pallas as pl
from jax.experimental.pallas import tpu as pltpu


def _round_up(v, m):
    return ((v + m - 1) // m) * m


# ----------------------------------------------------------------------------
# Pallas kernel 1: fused matmul + bias + optional relu   (bf16 MXU, f32 acc)
# Used only for the z (query) branch of the extractor.
# ----------------------------------------------------------------------------
def _fused_linear_kernel(x_ref, w_ref, b_ref, o_ref, *, relu):
    y = jnp.dot(x_ref[...], w_ref[...], preferred_element_type=jnp.float32)
    y = y + b_ref[...]
    if relu:
        y = jnp.maximum(y, 0.0)
    o_ref[...] = y.astype(o_ref.dtype)


def fused_linear(x, w, b, relu=False, out_dtype=jnp.float32, tm=256):
    """y = relu?(x @ w + b).  x: [M,K], w: [K,N], b: [N]."""
    M, K = x.shape
    N = w.shape[1]

    # Lane-dense output: pad N up to a multiple of 128 (sliced off afterwards).
    Np = _round_up(max(N, 128), 128)
    if Np != N:
        w = jnp.pad(w, ((0, 0), (0, Np - N)))
        b = jnp.pad(b, (0, Np - N))

    # Only an 8-row tail pad; the grid (cdiv) handles any partial last block.
    Mp = _round_up(M, 8)
    if Mp != M:
        x = jnp.pad(x, ((0, Mp - M), (0, 0)))
    tm_eff = min(tm, Mp)
    grid_m = pl.cdiv(Mp, tm_eff)

    out = pl.pallas_call(
        functools.partial(_fused_linear_kernel, relu=relu),
        out_shape=jax.ShapeDtypeStruct((Mp, Np), out_dtype),
        grid_spec=pltpu.PrefetchScalarGridSpec(
            num_scalar_prefetch=0,
            grid=(grid_m,),
            in_specs=[
                pl.BlockSpec((tm_eff, K), lambda i: (i, 0)),   # activation tile
                pl.BlockSpec((K, Np), lambda i: (0, 0)),       # weight (resident)
                pl.BlockSpec((1, Np), lambda i: (0, 0)),       # bias
            ],
            out_specs=pl.BlockSpec((tm_eff, Np), lambda i: (i, 0)),
        ),
        compiler_params=pltpu.CompilerParams(
            dimension_semantics=("parallel",),
            vmem_limit_bytes=32 * 1024 * 1024),
    )(x.astype(jnp.bfloat16), w.astype(jnp.bfloat16),
      b.reshape(1, Np).astype(jnp.float32))
    return out[:M, :N]


# ----------------------------------------------------------------------------
# Pallas kernel 2: the fused, HW-tiled x stage:
#   patch-embed (extractor) -> QG1 (query-modulated 1x1 conv) ->
#   RPN 3x3 conv (single im2col matmul) -> fused RPN loc||score heads.
# Tiles are row-blocks of TH image rows; a 1-row / 1-col halo is packed into
# the (overlapped) input tiles host-side, so every tap of the 3x3 conv is a
# contiguous row slice of a bf16 scratch and no per-tap masks are needed.
# ----------------------------------------------------------------------------
def _qg_rpn_kernel(xp_ref, wext_ref, bext_ref, wqg_ref, bqg_ref,
                   wcv_ref, bcv_ref, whd_ref, bhd_ref,
                   cor_ref, rpn_ref, pad_ref, col_ref, *, H, W, TH, C):
    Wp = W + 2                      # width incl. 1-col zero halo on each side
    TP = (TH + 2) * Wp              # tile rows incl. 1-row halo on each side
    NW = TH * Wp                    # output rows of this tile (padded width)
    B0 = Wp                         # flat offset of the first output row
    i = pl.program_id(0)

    # --- extractor patch embedding + query-modulated 1x1 conv (QG1) ---
    xw = xp_ref[...]                                                 # [TP, Kext] bf16
    emb = jnp.dot(xw, wext_ref[...], preferred_element_type=jnp.float32)
    emb = jnp.maximum(emb + bext_ref[...], 0.0)
    cor = jnp.dot(emb.astype(wqg_ref.dtype), wqg_ref[...],
                  preferred_element_type=jnp.float32)
    cor = jnp.maximum(cor + bqg_ref[...], 0.0)                       # [TP, C] f32

    # --- one validity mask: zero the width-halo columns and any halo row that
    #     falls outside the image (replaces the nine per-tap masks). ---
    flat = jax.lax.broadcasted_iota(jnp.int32, (TP, 1), 0)
    yy = flat // Wp
    xx = flat - yy * Wp
    row = i * TH + yy - 1
    valid = (xx >= 1) & (xx <= W) & (row >= 0) & (row < H)
    cor = cor * valid.astype(jnp.float32)
    cor_bf = cor.astype(jnp.bfloat16)

    # cor output for this tile (padded-width layout; halo cols dropped host-side)
    cor_ref[...] = cor_bf[B0:B0 + NW, :]

    # --- RPN 3x3 'same' conv as ONE im2col matmul (K = 9*C, MXU accumulates) ---
    pad_ref[0:1, :] = jnp.zeros((1, C), jnp.bfloat16)                # guard rows only;
    pad_ref[TP + 1:TP + 2, :] = jnp.zeros((1, C), jnp.bfloat16)      # interior overwritten
    pad_ref[1:TP + 1, :] = cor_bf
    t = 0
    for dy in (-1, 0, 1):
        for dx in (-1, 0, 1):
            s = dy * Wp + dx
            col_ref[:, t * C:(t + 1) * C] = pad_ref[1 + B0 + s:1 + B0 + s + NW, :]
            t += 1
    h = jnp.dot(col_ref[...], wcv_ref[...], preferred_element_type=jnp.float32)
    h = jnp.maximum(h + bcv_ref[...], 0.0)                           # [NW, C] f32

    # --- fused RPN loc||score heads (lane-dense output, N padded to 128) ---
    rpn_ref[...] = (jnp.dot(h.astype(whd_ref.dtype), whd_ref[...],
                            preferred_element_type=jnp.float32) + bhd_ref[...])


def _pick_row_tile(H, W, target_rows=512):
    """Largest divisor of H whose padded tile (TH*(W+2)) stays under target and
    keeps the output block sublane-aligned; falls back to the full height."""
    for th in range(H, 0, -1):
        if H % th:
            continue
        nw = th * (W + 2)
        if th == H:
            if nw <= target_rows:
                return th
            continue
        if nw <= target_rows and nw % 8 == 0:
            return th
    return H


def qg_rpn_fused(xp, w_ext, b_ext, w_qg_eff, b_qg, w_conv, b_conv,
                 w_head, b_head, H, W, row_tile_target=512):
    """xp: [H*W, Kext] stride-16 patches of the search image.
    Returns cor_feature [H*W, C] (bf16) and rpn loc||score [H*W, Nh] (f32)."""
    HW, Kext = xp.shape
    C = w_qg_eff.shape[1]
    Nh = w_head.shape[1]
    Nhp = _round_up(max(Nh, 128), 128)
    if Nhp != Nh:
        w_head = jnp.pad(w_head, ((0, 0), (0, Nhp - Nh)))
        b_head = jnp.pad(b_head, (0, Nhp - Nh))

    TH = _pick_row_tile(H, W, row_tile_target)
    nt = H // TH
    Wp = W + 2
    TP = (TH + 2) * Wp
    NW = TH * Wp

    # Build overlapped, zero-padded patch tiles host-side: tile i covers image
    # rows [i*TH-1, i*TH+TH+1) x cols [-1, W+1) (zeros outside the image).
    xp3 = xp.reshape(H, W, Kext)
    xp_pad = jnp.pad(xp3, ((1, 1), (1, 1), (0, 0)))
    ridx = jnp.arange(nt)[:, None] * TH + jnp.arange(TH + 2)[None, :]
    xp_wide = xp_pad[ridx].reshape(nt, TP, Kext)

    cor_w, rpn_w = pl.pallas_call(
        functools.partial(_qg_rpn_kernel, H=H, W=W, TH=TH, C=C),
        out_shape=(jax.ShapeDtypeStruct((H * Wp, C), jnp.bfloat16),
                   jax.ShapeDtypeStruct((H * Wp, Nhp), jnp.float32)),
        grid_spec=pltpu.PrefetchScalarGridSpec(
            num_scalar_prefetch=0,
            grid=(nt,),
            in_specs=[
                pl.BlockSpec((None, TP, Kext), lambda i: (i, 0, 0)),  # patch tile+halo
                pl.BlockSpec((Kext, C), lambda i: (0, 0)),            # extractor weight
                pl.BlockSpec((1, C), lambda i: (0, 0)),               # extractor bias
                pl.BlockSpec((C, C), lambda i: (0, 0)),               # QG weight (query-scaled)
                pl.BlockSpec((1, C), lambda i: (0, 0)),               # QG bias
                pl.BlockSpec((9 * C, C), lambda i: (0, 0)),           # 3x3 conv weight
                pl.BlockSpec((1, C), lambda i: (0, 0)),               # conv bias
                pl.BlockSpec((C, Nhp), lambda i: (0, 0)),             # loc||score weight
                pl.BlockSpec((1, Nhp), lambda i: (0, 0)),             # loc||score bias
            ],
            out_specs=[
                pl.BlockSpec((NW, C), lambda i: (i, 0)),
                pl.BlockSpec((NW, Nhp), lambda i: (i, 0)),
            ],
            scratch_shapes=[
                pltpu.VMEM((TP + 2, C), jnp.bfloat16),       # halo-padded cor (+2 guards)
                pltpu.VMEM((NW, 9 * C), jnp.bfloat16),       # im2col staging
            ],
        ),
        compiler_params=pltpu.CompilerParams(
            dimension_semantics=("parallel",),
            vmem_limit_bytes=32 * 1024 * 1024,
        ),
    )(xp_wide.astype(jnp.bfloat16),
      w_ext.astype(jnp.bfloat16), b_ext.reshape(1, -1).astype(jnp.float32),
      w_qg_eff.astype(jnp.bfloat16), b_qg.reshape(1, -1).astype(jnp.float32),
      w_conv.astype(jnp.bfloat16), b_conv.reshape(1, -1).astype(jnp.float32),
      w_head.astype(jnp.bfloat16), b_head.reshape(1, -1).astype(jnp.float32))

    # Drop the width-halo columns (host-side reshape/slice only).
    cor = cor_w.reshape(H, Wp, C)[:, 1:W + 1, :].reshape(HW, C)
    rpn = rpn_w.reshape(H, Wp, Nhp)[:, 1:W + 1, :Nh].reshape(HW, Nh)
    return cor, rpn


# ----------------------------------------------------------------------------
# Pallas kernel 3: RCNN tail — fc (query-modulated) -> (cls_loc || cls_score)
# chained in a single kernel (all weights resident, M is tiny).
# ----------------------------------------------------------------------------
def _rcnn_head_kernel(x_ref, w1_ref, b1_ref, w2_ref, b2_ref, o_ref):
    h = jnp.dot(x_ref[...], w1_ref[...], preferred_element_type=jnp.float32)
    h = jnp.maximum(h + b1_ref[...], 0.0)
    y = jnp.dot(h.astype(w2_ref.dtype), w2_ref[...],
                preferred_element_type=jnp.float32) + b2_ref[...]
    o_ref[...] = y


def rcnn_head_fused(x, w_fc, b_fc, w_heads, b_heads):
    R, C = x.shape
    Cout = w_fc.shape[1]
    N = w_heads.shape[1]
    Np = _round_up(max(N, 128), 128)
    if Np != N:
        w_heads = jnp.pad(w_heads, ((0, 0), (0, Np - N)))
        b_heads = jnp.pad(b_heads, (0, Np - N))
    Rp = _round_up(R, 8)
    if Rp != R:
        x = jnp.pad(x, ((0, Rp - R), (0, 0)))

    out = pl.pallas_call(
        _rcnn_head_kernel,
        out_shape=jax.ShapeDtypeStruct((Rp, Np), jnp.float32),
        grid_spec=pltpu.PrefetchScalarGridSpec(
            num_scalar_prefetch=0,
            grid=(1,),
            in_specs=[
                pl.BlockSpec((Rp, C), lambda i: (0, 0)),
                pl.BlockSpec((C, Cout), lambda i: (0, 0)),
                pl.BlockSpec((1, Cout), lambda i: (0, 0)),
                pl.BlockSpec((Cout, Np), lambda i: (0, 0)),
                pl.BlockSpec((1, Np), lambda i: (0, 0)),
            ],
            out_specs=pl.BlockSpec((Rp, Np), lambda i: (0, 0)),
        ),
        compiler_params=pltpu.CompilerParams(
            dimension_semantics=("arbitrary",),
            vmem_limit_bytes=32 * 1024 * 1024),
    )(x.astype(jnp.bfloat16),
      w_fc.astype(jnp.bfloat16), b_fc.reshape(1, -1).astype(jnp.float32),
      w_heads.astype(jnp.bfloat16), b_heads.reshape(1, -1).astype(jnp.float32))
    return out[:R, :N]


# ----------------------------------------------------------------------------
# JAX glue (reshapes, anchors, proposal decode, RoIAlign gather)
# ----------------------------------------------------------------------------
def patchify(img_nchw, stride):
    """[1, C, H, W] -> [Hf*Wf, stride*stride*C] non-overlapping stride patches."""
    _, C, H, W = img_nchw.shape
    Hf, Wf = H // stride, W // stride
    p = img_nchw[0].reshape(C, Hf, stride, Wf, stride)
    p = p.transpose(1, 3, 2, 4, 0).reshape(Hf * Wf, stride * stride * C)
    return p, Hf, Wf


def adaptive_avg_pool(feat_flat, H, W, out):
    # NOTE: requires H and W divisible by `out` (query images are 112x112 -> 7x7).
    C = feat_flat.shape[1]
    f = feat_flat.reshape(H, W, C)
    f = f.reshape(out, H // out, out, W // out, C).mean(axis=(1, 3))
    return f.reshape(out * out, C)


def generate_anchor_base(base_size, ratios, scales):
    ab = []
    for r in ratios:
        for s in scales:
            h = base_size * s * math.sqrt(r)
            w = base_size * s * math.sqrt(1.0 / r)
            ab.append([-h / 2.0, -w / 2.0, h / 2.0, w / 2.0])
    return jnp.asarray(ab, jnp.float32)  # [n_anchor, 4] in (y1,x1,y2,x2)


def enumerate_anchors(anchor_base, feat_stride, H, W):
    sy = jnp.arange(H, dtype=jnp.float32) * feat_stride
    sx = jnp.arange(W, dtype=jnp.float32) * feat_stride
    yy, xx = jnp.meshgrid(sy, sx, indexing="ij")
    shifts = jnp.stack([yy.ravel(), xx.ravel(), yy.ravel(), xx.ravel()], axis=1)
    anchors = shifts[:, None, :] + anchor_base[None, :, :]
    return anchors.reshape(-1, 4)


def loc2bbox(anchors, locs):
    h = anchors[:, 2] - anchors[:, 0]
    w = anchors[:, 3] - anchors[:, 1]
    cy = anchors[:, 0] + 0.5 * h
    cx = anchors[:, 1] + 0.5 * w
    dy, dx, dh, dw = locs[:, 0], locs[:, 1], locs[:, 2], locs[:, 3]
    ncy = dy * h + cy
    ncx = dx * w + cx
    nh = jnp.exp(dh) * h
    nw = jnp.exp(dw) * w
    return jnp.stack([ncy - 0.5 * nh, ncx - 0.5 * nw,
                      ncy + 0.5 * nh, ncx + 0.5 * nw], axis=1)


def roi_align_simple(feat_flat, H, W, rois, out_size, spatial_scale):
    """Simplified RoIAlign, 1 bilinear sample per bin.  Returns [R, P*P, C]."""
    # TODO(synk): data-dependent bilinear gather stays in JAX glue (no clean
    # rectangular-BlockSpec Pallas equivalent without manual DMA gather).
    C = feat_flat.shape[1]
    feat = feat_flat.reshape(H, W, C)
    R = rois.shape[0]
    y1 = rois[:, 0] * spatial_scale
    x1 = rois[:, 1] * spatial_scale
    y2 = rois[:, 2] * spatial_scale
    x2 = rois[:, 3] * spatial_scale
    bh = jnp.maximum(y2 - y1, 1e-2) / out_size
    bw = jnp.maximum(x2 - x1, 1e-2) / out_size
    grid = jnp.arange(out_size, dtype=jnp.float32) + 0.5
    py = y1[:, None] + grid[None, :] * bh[:, None]            # [R, P]
    px = x1[:, None] + grid[None, :] * bw[:, None]            # [R, P]
    yy = jnp.broadcast_to(py[:, :, None], (R, out_size, out_size))
    xx = jnp.broadcast_to(px[:, None, :], (R, out_size, out_size))
    y0f = jnp.floor(yy)
    x0f = jnp.floor(xx)
    ly = yy - y0f
    lx = xx - x0f
    y0 = jnp.clip(y0f.astype(jnp.int32), 0, H - 1)
    y1i = jnp.clip(y0 + 1, 0, H - 1)
    x0 = jnp.clip(x0f.astype(jnp.int32), 0, W - 1)
    x1i = jnp.clip(x0 + 1, 0, W - 1)

    def g(yi, xi):
        return feat[yi, xi]                                   # [R, P, P, C]

    v = (g(y0, x0) * ((1 - ly) * (1 - lx))[..., None]
         + g(y0, x1i) * ((1 - ly) * lx)[..., None]
         + g(y1i, x0) * (ly * (1 - lx))[..., None]
         + g(y1i, x1i) * (ly * lx)[..., None])
    return v.reshape(R, out_size * out_size, C)


# ----------------------------------------------------------------------------
# Parameters (deterministic synthetic init — shapes from the module __init__)
# ----------------------------------------------------------------------------
C_FEAT = 256        # RPN(256, 256), QG1(c=256)
FEAT_STRIDE = 16
N_ANCHOR = 9        # 3 scales x 3 ratios


def init_params(key, num_classes):
    n_class = num_classes + 1
    names_shapes = [
        ("W_ext", (FEAT_STRIDE * FEAT_STRIDE * 3, C_FEAT)), ("b_ext", (C_FEAT,)),
        ("W_qg", (C_FEAT, C_FEAT)), ("b_qg", (C_FEAT,)),
        ("W_rpn_conv", (9 * C_FEAT, C_FEAT)), ("b_rpn_conv", (C_FEAT,)),
        ("W_rpn_loc", (C_FEAT, 4 * N_ANCHOR)), ("b_rpn_loc", (4 * N_ANCHOR,)),
        ("W_rpn_score", (C_FEAT, 2 * N_ANCHOR)), ("b_rpn_score", (2 * N_ANCHOR,)),
        ("W_fc", (C_FEAT, C_FEAT)), ("b_fc", (C_FEAT,)),
        ("W_cls_loc", (C_FEAT, 4 * n_class)), ("b_cls_loc", (4 * n_class,)),
        ("W_cls_score", (C_FEAT, n_class)), ("b_cls_score", (n_class,)),
    ]
    params = {}
    keys = jax.random.split(key, len(names_shapes))
    for (name, shape), k in zip(names_shapes, keys):
        if name.startswith("W"):
            params[name] = jax.random.normal(k, shape, jnp.float32) * 0.02
        else:
            params[name] = jnp.zeros(shape, jnp.float32)
    return params


# ----------------------------------------------------------------------------
# globaltrack forward
# ----------------------------------------------------------------------------
def globaltrack_forward(params, x, z, scale=1.0, num_classes=2,
                        anchor_scales=(8, 16, 32), ratios=(0.5, 1, 2),
                        n_rois=8):
    # batch = 1 (single-image detection pipeline, matching rois/roi_indices use).
    del scale  # TODO(synk): `scale` only affects min-size proposal filtering.
    n_class = num_classes + 1
    img_h, img_w = float(x.shape[2]), float(x.shape[3])

    # ---- extractor on the query (z) branch only; x branch is fused into kernel 2 ----
    # TODO(synk): resnet50 backbone (external submodule) approximated by a
    # single stride-16 patch-embedding projection, run in the Pallas kernels.
    zp, zh, zw = patchify(z, FEAT_STRIDE)
    z_feat = fused_linear(zp, params["W_ext"], params["b_ext"],
                          relu=True, out_dtype=jnp.bfloat16)          # [zh*zw, 256]

    # ---- RoIAlign(z_feature, (7,7), 1/16): whole-image query RoI ----
    z_feat7 = adaptive_avg_pool(z_feat.astype(jnp.float32), zh, zw, 7)  # [49, 256]
    z_vec = jnp.mean(z_feat7, axis=0)                                   # [256]

    # ---- extractor(x) + QG1 + RPN 3x3 conv + fused loc||score heads, ONE tiled kernel ----
    # Channel modulation folded into the QG weight: (x*z)@W == x@(z[:,None]*W).
    xp, xh, xw = patchify(x, FEAT_STRIDE)
    w_qg_eff = params["W_qg"] * z_vec[:, None]
    w_rpn_head = jnp.concatenate([params["W_rpn_loc"], params["W_rpn_score"]], axis=1)
    b_rpn_head = jnp.concatenate([params["b_rpn_loc"], params["b_rpn_score"]], axis=0)
    cor_feat, rpn_out = qg_rpn_fused(
        xp, params["W_ext"], params["b_ext"],
        w_qg_eff, params["b_qg"],
        params["W_rpn_conv"], params["b_rpn_conv"],
        w_rpn_head, b_rpn_head, xh, xw)
    n_loc = params["W_rpn_loc"].shape[1]
    rpn_locs = rpn_out[:, :n_loc]                             # [HW, 36] f32
    rpn_scores = rpn_out[:, n_loc:]                           # [HW, 18] f32

    anchor = enumerate_anchors(
        generate_anchor_base(16, ratios, anchor_scales), FEAT_STRIDE, xh, xw)
    locs_flat = rpn_locs.reshape(-1, 4)
    fg = jax.nn.softmax(rpn_scores.reshape(-1, 2), axis=-1)[:, 1]
    boxes = loc2bbox(anchor, locs_flat)
    boxes = jnp.stack([jnp.clip(boxes[:, 0], 0.0, img_h),
                       jnp.clip(boxes[:, 1], 0.0, img_w),
                       jnp.clip(boxes[:, 2], 0.0, img_h),
                       jnp.clip(boxes[:, 3], 0.0, img_w)], axis=1)
    # TODO(synk): NMS in the RPN ProposalCreator has no clean Pallas
    # equivalent; proposals are selected by plain top-k foreground score.
    order = jnp.argsort(-fg)[:n_rois]
    rois = boxes[order]                                       # [R, 4]
    roi_indices = jnp.zeros((n_rois,), jnp.int32)

    # ---- RCNN: RoIAlign + query-modulated fc -> fused classifier heads ----
    roi_feats = roi_align_simple(cor_feat.astype(jnp.float32), xh, xw,
                                 rois, 7, 1.0 / FEAT_STRIDE)  # [R, 49, 256]
    roi_pooled = jnp.mean(roi_feats, axis=1)                  # [R, 256]
    w_fc_eff = params["W_fc"] * z_vec[:, None]
    w_heads = jnp.concatenate([params["W_cls_loc"], params["W_cls_score"]], axis=1)
    b_heads = jnp.concatenate([params["b_cls_loc"], params["b_cls_score"]], axis=0)
    out = rcnn_head_fused(roi_pooled, w_fc_eff, params["b_fc"], w_heads, b_heads)
    rcnn_cls_locs = out[:, :4 * n_class]
    rcnn_scores = out[:, 4 * n_class:4 * n_class + n_class]

    return rcnn_cls_locs, rcnn_scores, rois, roi_indices


# ----------------------------------------------------------------------------
if __name__ == "__main__":
    num_classes = 2
    key = jax.random.PRNGKey(0)
    kx, kz, kp = jax.random.split(key, 3)
    # PyTorch-style NCHW inputs; stride-16 backbone => x feature 16x32
    # (two row-tiles -> exercises the halo/tiled path), z feature 7x7.
    x = jax.random.normal(kx, (1, 3, 256, 512), jnp.float32)
    z = jax.random.normal(kz, (1, 3, 112, 112), jnp.float32)
    params = init_params(kp, num_classes)

    outs = globaltrack_forward(params, x, z, scale=1.0, num_classes=num_classes)
    outs = jax.block_until_ready(outs)

    rcnn_cls_locs, rcnn_scores, rois, roi_indices = outs
    assert rcnn_cls_locs.shape == (8, 4 * (num_classes + 1))
    assert rcnn_scores.shape == (8, num_classes + 1)
    assert rois.shape == (8, 4)
    assert roi_indices.shape == (8,)
    print("KERNEL_OK")
</pallas_src>

<mosaic_0001>
module attributes {stable_mosaic.version = 11 : i64} {
  func.func @_fused_linear_kernel(%arg0: i32, %arg1: memref<56x768xbf16, #tpu.memory_space<vmem>>, %arg2: memref<768x256xbf16, #tpu.memory_space<vmem>>, %arg3: memref<1x256xf32, #tpu.memory_space<vmem>>, %arg4: memref<56x256xbf16, #tpu.memory_space<vmem>>) attributes {dimension_semantics = [#tpu.dimension_semantics<parallel>], iteration_bounds = array<i64: 1>, scalar_prefetch = 0 : i64, scratch_operands = 0 : i64, tpu.core_type = #tpu.core_type<tc>, window_params = [{transform_indices = @transform_0, window_bounds = array<i64: 56, 768>}, {pipeline_mode = #tpu.pipeline_mode<synchronous>, transform_indices = @transform_1, window_bounds = array<i64: 768, 256>}, {pipeline_mode = #tpu.pipeline_mode<synchronous>, transform_indices = @transform_2, window_bounds = array<i64: 1, 256>}, {transform_indices = @transform_3, window_bounds = array<i64: 56, 256>}]} {
    %c0 = arith.constant 0 : index
    %c0_0 = arith.constant 0 : index
    %0 = vector.load %arg1[%c0, %c0_0] : memref<56x768xbf16, #tpu.memory_space<vmem>>, vector<56x768xbf16>
    %c0_1 = arith.constant 0 : index
    %c0_2 = arith.constant 0 : index
    %1 = vector.load %arg2[%c0_1, %c0_2] : memref<768x256xbf16, #tpu.memory_space<vmem>>, vector<768x256xbf16>
    %cst = arith.constant dense<0.000000e+00> : vector<56x256xf32>
    %2 = tpu.matmul %0, %1, %cst {dimension_numbers = #tpu.dot_dimension_numbers<[1], [0], [0], [1], [0, 0, 1, 1], [], []>} : vector<56x768xbf16>, vector<768x256xbf16>, vector<56x256xf32> -> vector<56x256xf32>
    %c0_3 = arith.constant 0 : index
    %c0_4 = arith.constant 0 : index
    %3 = vector.load %arg3[%c0_3, %c0_4] : memref<1x256xf32, #tpu.memory_space<vmem>>, vector<1x256xf32>
    %4 = vector.broadcast %3 : vector<1x256xf32> to vector<56x256xf32>
    %5 = arith.addf %2, %4 : vector<56x256xf32>
    %cst_5 = arith.constant 0.000000e+00 : f32
    %6 = vector.broadcast %cst_5 : f32 to vector<56x256xf32>
    %7 = arith.maximumf %5, %6 : vector<56x256xf32>
    %8 = arith.truncf %7 : vector<56x256xf32> to vector<56x256xbf16>
    %c0_6 = arith.constant 0 : index
    %c0_7 = arith.constant 0 : index
    %9 = vector.load %arg4[%c0_6, %c0_7] : memref<56x256xbf16, #tpu.memory_space<vmem>>, vector<56x256xbf16>
    tpu.vector_store %arg4[%c0_6, %c0_7], %8 {strides = array<i32>} : memref<56x256xbf16, #tpu.memory_space<vmem>>, vector<56x256xbf16>,
    return
  }
  func.func @transform_0(%arg0: i32) -> (i32, i32) {
    %c0_i32 = arith.constant 0 : i32
    %c0_i32_0 = arith.constant 0 : i32
    return %arg0, %c0_i32 : i32, i32
  }
  func.func @transform_1(%arg0: i32) -> (i32, i32) {
    %c0_i32 = arith.constant 0 : i32
    %c0_i32_0 = arith.constant 0 : i32
    %c0_i32_1 = arith.constant 0 : i32
    return %c0_i32, %c0_i32_0 : i32, i32
  }
  func.func @transform_2(%arg0: i32) -> (i32, i32) {
    %c0_i32 = arith.constant 0 : i32
    %c0_i32_0 = arith.constant 0 : i32
    %c0_i32_1 = arith.constant 0 : i32
    return %c0_i32, %c0_i32_0 : i32, i32
  }
  func.func @transform_3(%arg0: i32) -> (i32, i32) {
    %c0_i32 = arith.constant 0 : i32
    %c0_i32_0 = arith.constant 0 : i32
    return %arg0, %c0_i32 : i32, i32
  }
}

</mosaic_0001>

<bundles_post_ra>
// kernel: tpu_custom_call.1
= control target key start
LH: loop header
LB: loop body
LE: loop exit
PB: predicated region body
PF: predicated region fallthrough
CT: control target
= control target key end

     0   :  { %8 = vsyncpa [#allocation3], 0  ;;  %s2027_s0 = inlined_call_operand.hbm [shape: bf16[56,768], index: 0, kind: input, shape index: {}]   ;;  %s2028_s1 = inlined_call_operand.hbm [shape: bf16[768,256], index: 1, kind: input, shape index: {}]   ;;  %s2029_s2 = inlined_call_operand.hbm [shape: f32[1,256], index: 2, kind: input, shape index: {}]   ;;  %s2030_s3 = inlined_call_operand.hbm [shape: bf16[56,256], index: 3, kind: output, shape index: {}]  }
   0x1   :  { %9 = vsyncpa [#allocation6], 0  ;;  %s28_s14 = sshll.u32 %s2028_s1, 4  ;;  %s29_s14 = int_to_ptr.hbm [resolvable:$true] %s28_s14 }
   0x2   :  { %10 = vsyncpa [#allocation4], 0  ;;  %s1838_s15 = smov [#allocation5]   ;;  %s15_s19 = sshll.u32 %s2027_s0, 4  ;;  %s16_s19 = int_to_ptr.hbm [resolvable:$true] %s15_s19 }
   0x3   :  { %s30_s16 = sshll.u32 %s1838_s15, 4  ;;  %s1839_s20 = smov 128   ;;  %s31_s16 = int_to_ptr.vmem [resolvable:$true] %s30_s16 }
   0x4   :  { %s1840_s21 = smov 8   ;;  %s1841_s22 = smov [#allocation2]  }
   0x5   :  { %36 = dma.hbm_to_vmem [thread:$0]  %s29_s14, 12288, %s31_s16, [#allocation6], %s1839_s20, %s1839_s20, %s1840_s21  }
   0x6   :  { %s17_s23 = sshll.u32 %s1841_s22, 4  ;;  %s1842_s1 = smov 384   ;;  %s18_s23 = int_to_ptr.vmem [resolvable:$true] %s17_s23 }
   0x7   :  { %s1843_s24 = smov 24   ;;  %s42_s27 = sshll.u32 %s2029_s2, 4  ;;  %s43_s27 = int_to_ptr.hbm [resolvable:$true] %s42_s27 }
   0x8   :  { %23 = dma.hbm_to_vmem [thread:$0]  %s16_s19, 2688, %s18_s23, [#allocation3], %s1842_s1, %s1842_s1, %s1843_s24  }
   0x9   :  { %s1844_s28 = smov [#allocation7]  }
   0xa   :  { %s44_s0 = sshll.u32 %s1844_s28, 4  ;;  %s45_s0 = int_to_ptr.vmem [resolvable:$true] %s44_s0 }
   0xb   :  { %47 = dma.hbm_to_vmem [thread:$0]  %s43_s27, 32, %s45_s0, [#allocation6]  }
   0xc   :  { %1832 = dma.done.wait [#allocation3], 2688  }
   0xd   :  { %1833 = vsyncadd [#allocation3], 4294964608 }
   0xe   :  { %1834 = dma.done.wait [#allocation6], 12320  }
   0xf   :  { %1835 = vsyncadd [#allocation6], 4294954976  ;;  %v1288_v0 = vld [vmem:[#allocation5 + $0x70] sm:$0xf]  ;;  %v1647_v1 = vld [vmem:[#allocation5 + $0x74] sm:$0xf0] }
  0x10   :  { %v1352_v2 = vld [vmem:[#allocation5 + $0xf0] sm:$0xf]  ;;  %v1289_v3 = vor.u32 %v1647_v1, %v1288_v0  ;;  %v1663_v4 = vld [vmem:[#allocation5 + $0xf4] sm:$0xf0]  ;;  %v1280_v11 = vld [vmem:[#allocation5 + $0x60] sm:$0xf] }
  0x11   :  { %v1416_v5 = vld [vmem:[#allocation5 + $0x170] sm:$0xf]  ;;  %v1679_v6 = vld [vmem:[#allocation5 + $0x174] sm:$0xf0]  ;;  %v1353_v7 = vor.u32 %v1663_v4, %v1352_v2  ;;  %v1645_v13 = vld [vmem:[#allocation5 + $0x64] sm:$0xf0] }
  0x12   :  { %v1417_v8 = vor.u32 %v1679_v6, %v1416_v5  ;;  %v1480_v9 = vld [vmem:[#allocation5 + $0x1f0] sm:$0xf]  ;;  %v1695_v10 = vld [vmem:[#allocation5 + $0x1f4] sm:$0xf0]  ;;  %774 = vmatpush.bf16.msra.mxu0 %v1289_v3  ;;  %v1344_v14 = vld [vmem:[#allocation5 + $0xe0] sm:$0xf]  ;;  %v1281_v16 = vor.u32 %v1645_v13, %v1280_v11 }
  0x13   :  { %v1481_v12 = vor.u32 %v1695_v10, %v1480_v9  ;;  %v1661_v15 = vld [vmem:[#allocation5 + $0xe4] sm:$0xf0]  ;;  %802 = vmatpush.bf16.msra.mxu1 %v1353_v7  ;;  %v1408_v18 = vld [vmem:[#allocation5 + $0x160] sm:$0xf]  ;;  %v1272_v23 = vld [vmem:[#allocation5 + $0x50] sm:$0xf] }
  0x14   :  { %830 = vmatpush.bf16.msra.mxu2 %v1417_v8  ;;  %v1345_v17 = vor.u32 %v1661_v15, %v1344_v14  ;;  %v1677_v19 = vld [vmem:[#allocation5 + $0x164] sm:$0xf0]  ;;  %v1472_v20 = vld [vmem:[#allocation5 + $0x1e0] sm:$0xf]  ;;  %v1643_v24 = vld [vmem:[#allocation5 + $0x54] sm:$0xf0] }
  0x15   :  { %858 = vmatpush.bf16.msra.mxu3 %v1481_v12  ;;  %v1409_v21 = vor.u32 %v1677_v19, %v1408_v18  ;;  %v1693_v22 = vld [vmem:[#allocation5 + $0x1e4] sm:$0xf0]  ;;  %v1336_v26 = vld [vmem:[#allocation5 + $0xd0] sm:$0xf]  ;;  %v1659_v27 = vld [vmem:[#allocation5 + $0xd4] sm:$0xf0]  ;;  %v1273_v29 = vor.u32 %v1643_v24, %v1272_v23 }
  0x16   :  { %v1473_v25 = vor.u32 %v1693_v22, %v1472_v20  ;;  %v1400_v28 = vld [vmem:[#allocation5 + $0x150] sm:$0xf]  ;;  %775 = vmatpush.bf16.msra.mxu0 %v1281_v16  ;;  %v1675_v30 = vld [vmem:[#allocation5 + $0x154] sm:$0xf0]  ;;  %v1337_v33 = vor.u32 %v1659_v27, %v1336_v26  ;;  %v1264_v35 = vld [vmem:[#allocation5 + $0x40] sm:$0xf] }
  0x17   :  { %v1464_v31 = vld [vmem:[#allocation5 + $0x1d0] sm:$0xf]  ;;  %v1691_v32 = vld [vmem:[#allocation5 + $0x1d4] sm:$0xf0]  ;;  %803 = vmatpush.bf16.msra.mxu1 %v1345_v17  ;;  %v1401_v34 = vor.u32 %v1675_v30, %v1400_v28  ;;  %v1641_v36 = vld [vmem:[#allocation5 + $0x44] sm:$0xf0] }
  0x18   :  { %831 = vmatpush.bf16.msra.mxu2 %v1409_v21  ;;  %v1328_v37 = vld [vmem:[#allocation5 + $0xc0] sm:$0xf]  ;;  %v1465_v38 = vor.u32 %v1691_v32, %v1464_v31  ;;  %v1657_v39 = vld [vmem:[#allocation5 + $0xc4] sm:$0xf0]  ;;  %v1265_v44 = vor.u32 %v1641_v36, %v1264_v35  ;;  %v1256_v47 = vld [vmem:[#allocation5 + $0x30] sm:$0xf] }
  0x19   :  { %859 = vmatpush.bf16.msra.mxu3 %v1473_v25  ;;  %v1392_v40 = vld [vmem:[#allocation5 + $0x140] sm:$0xf]  ;;  %v1673_v41 = vld [vmem:[#allocation5 + $0x144] sm:$0xf0]  ;;  %v1329_v45 = vor.u32 %v1657_v39, %v1328_v37  ;;  %v1639_v48 = vld [vmem:[#allocation5 + $0x34] sm:$0xf0] }
  0x1a   :  { %v1456_v42 = vld [vmem:[#allocation5 + $0x1c0] sm:$0xf]  ;;  %v1689_v43 = vld [vmem:[#allocation5 + $0x1c4] sm:$0xf0]  ;;  %776 = vmatpush.bf16.msra.mxu0 %v1273_v29  ;;  %v1393_v46 = vor.u32 %v1673_v41, %v1392_v40  ;;  %v1320_v49 = vld [vmem:[#allocation5 + $0xb0] sm:$0xf]  ;;  %v1257_v56 = vor.u32 %v1639_v48, %v1256_v47 }
  0x1b   :  { %804 = vmatpush.bf16.msra.mxu1 %v1337_v33  ;;  %v1457_v50 = vor.u32 %v1689_v43, %v1456_v42  ;;  %v1655_v51 = vld [vmem:[#allocation5 + $0xb4] sm:$0xf0]  ;;  %v1384_v52 = vld [vmem:[#allocation5 + $0x130] sm:$0xf]  ;;  %v1248_v59 = vld [vmem:[#allocation5 + $0x20] sm:$0xf] }
  0x1c   :  { %832 = vmatpush.bf16.msra.mxu2 %v1401_v34  ;;  %v1671_v53 = vld [vmem:[#allocation5 + $0x134] sm:$0xf0]  ;;  %v1448_v54 = vld [vmem:[#allocation5 + $0x1b0] sm:$0xf]  ;;  %v1321_v57 = vor.u32 %v1655_v51, %v1320_v49  ;;  %v1637_v60 = vld [vmem:[#allocation5 + $0x24] sm:$0xf0] }
  0x1d   :  { %860 = vmatpush.bf16.msra.mxu3 %v1465_v38  ;;  %v1687_v55 = vld [vmem:[#allocation5 + $0x1b4] sm:$0xf0]  ;;  %v1385_v58 = vor.u32 %v1671_v53, %v1384_v52  ;;  %v1312_v61 = vld [vmem:[#allocation5 + $0xa0] sm:$0xf]  ;;  %v1653_v63 = vld [vmem:[#allocation5 + $0xa4] sm:$0xf0]  ;;  %v1249_v4 = vor.u32 %v1637_v60, %v1248_v59 }
  0x1e   :  { %777 = vmatpush.bf16.msra.mxu0 %v1265_v44  ;;  %v1449_v62 = vor.u32 %v1687_v55, %v1448_v54  ;;  %v1376_v0 = vld [vmem:[#allocation5 + $0x120] sm:$0xf]  ;;  %v1669_v1 = vld [vmem:[#allocation5 + $0x124] sm:$0xf0]  ;;  %v1313_v5 = vor.u32 %v1653_v63, %v1312_v61  ;;  %v1240_v7 = vld [vmem:[#allocation5 + $0x10] sm:$0xf] }
  0x1f   :  { %805 = vmatpush.bf16.msra.mxu1 %v1329_v45  ;;  %v1440_v2 = vld [vmem:[#allocation5 + $0x1a0] sm:$0xf]  ;;  %v1685_v3 = vld [vmem:[#allocation5 + $0x1a4] sm:$0xf0]  ;;  %v1377_v6 = vor.u32 %v1669_v1, %v1376_v0  ;;  %v1635_v8 = vld [vmem:[#allocation5 + $0x14] sm:$0xf0] }
  0x20   :  { %833 = vmatpush.bf16.msra.mxu2 %v1393_v46  ;;  %v1304_v9 = vld [vmem:[#allocation5 + $0x90] sm:$0xf]  ;;  %v1441_v10 = vor.u32 %v1685_v3, %v1440_v2  ;;  %v1651_v11 = vld [vmem:[#allocation5 + $0x94] sm:$0xf0]  ;;  %v1232_v16 = vld [vmem:[#allocation5] sm:$0xf]  ;;  %v1241_v17 = vor.u32 %v1635_v8, %v1240_v7 }
  0x21   :  { %861 = vmatpush.bf16.msra.mxu3 %v1457_v50  ;;  %v1368_v12 = vld [vmem:[#allocation5 + $0x110] sm:$0xf]  ;;  %v1667_v13 = vld [vmem:[#allocation5 + $0x114] sm:$0xf0]  ;;  %v1633_v18 = vld [vmem:[#allocation5 + $0x4] sm:$0xf0]  ;;  %v1305_v21 = vor.u32 %v1651_v11, %v1304_v9 }
  0x22   :  { %778 = vmatpush.bf16.msra.mxu0 %v1257_v56  ;;  %v1432_v14 = vld [vmem:[#allocation5 + $0x190] sm:$0xf]  ;;  %v1683_v15 = vld [vmem:[#allocation5 + $0x194] sm:$0xf0]  ;;  %v1296_v19 = vld [vmem:[#allocation5 + $0x80] sm:$0xf]  ;;  %v1369_v22 = vor.u32 %v1667_v13, %v1368_v12  ;;  %v1233_v34 = vor.u32 %v1633_v18, %v1232_v16 }
  0x23   :  { %806 = vmatpush.bf16.msra.mxu1 %v1321_v57  ;;  %v1649_v20 = vld [vmem:[#allocation5 + $0x84] sm:$0xf0]  ;;  %v1360_v23 = vld [vmem:[#allocation5 + $0x100] sm:$0xf]  ;;  %v1433_v26 = vor.u32 %v1683_v15, %v1432_v14  ;;  %v1160_v28 = vld [vmem:[#allocation2] sm:$0xf] }
  0x24   :  { %834 = vmatpush.bf16.msra.mxu2 %v1385_v58  ;;  %v1665_v24 = vld [vmem:[#allocation5 + $0x104] sm:$0xf0]  ;;  %v1424_v25 = vld [vmem:[#allocation5 + $0x180] sm:$0xf]  ;;  %v1617_v29 = vld [vmem:[#allocation2 + $0x14] sm:$0xf0]  ;;  %v1297_v38 = vor.u32 %v1649_v20, %v1296_v19 }
  0x25   :  { %862 = vmatpush.bf16.msra.mxu3 %v1449_v62  ;;  %v1681_v27 = vld [vmem:[#allocation5 + $0x184] sm:$0xf0]  ;;  %v1614_v30 = vld [vmem:[#allocation2 + $0x4] sm:$0xf]  ;;  %v1162_v31 = vld [vmem:[#allocation2 + $0x18] sm:$0xf0]  ;;  %v1361_v39 = vor.u32 %v1665_v24, %v1360_v23  ;;  %v1878_v48 = vor.u32 %v1617_v29, %v1160_v28 }
  0x26   :  { %779 = vmatpush.bf16.msra.mxu0 %v1249_v4  ;;  %v1646_v32 = vld [vmem:[#allocation5 + $0x74] sm:$0xf]  ;;  %v1290_v33 = vld [vmem:[#allocation5 + $0x78] sm:$0xf0]  ;;  %v1168_v35 = vld [vmem:[#allocation2 + $0x8] sm:$0xf]  ;;  %v1425_v43 = vor.u32 %v1681_v27, %v1424_v25  ;;  %v1880_v53 = vor.u32 %v1614_v30, %v1162_v31 }
  0x27   :  { %807 = vmatpush.bf16.msra.mxu1 %v1313_v5  ;;  %v1662_v36 = vld [vmem:[#allocation5 + $0xf4] sm:$0xf]  ;;  %v1354_v37 = vld [vmem:[#allocation5 + $0xf8] sm:$0xf0]  ;;  %v1618_v40 = vld [vmem:[#allocation2 + $0x1c] sm:$0xf0]  ;;  %v1293_v44 = vor.u32 %v1646_v32, %v1290_v33 }
  0x28   :  { %835 = vmatpush.bf16.msra.mxu2 %v1377_v6  ;;  %v1615_v41 = vld [vmem:[#allocation2 + $0xc] sm:$0xf]  ;;  %v1170_v42 = vld [vmem:[#allocation2 + $0x20] sm:$0xf0]  ;;  %v1544_v45 = vld [vmem:[#allocation5 + $0x270] sm:$0xf]  ;;  %v1357_v49 = vor.u32 %v1662_v36, %v1354_v37  ;;  %v1882_v54 = vor.u32 %v1618_v40, %v1168_v35 }
  0x29   :  { %863 = vmatpush.bf16.msra.mxu3 %v1441_v10  ;;  %v1711_v46 = vld [vmem:[#allocation5 + $0x274] sm:$0xf0]  ;;  %v1608_v47 = vld [vmem:[#allocation5 + $0x2f0] sm:$0xf]  ;;  %v1644_v51 = vld [vmem:[#allocation5 + $0x64] sm:$0xf]  ;;  %v1884_v57 = vor.u32 %v1615_v41, %v1170_v42 }
  0x2a   :  { %780 = vmatpush.bf16.msra.mxu0 %v1241_v17  ;;  %v1727_v50 = vld [vmem:[#allocation5 + $0x2f4] sm:$0xf0]  ;;  %v1282_v52 = vld [vmem:[#allocation5 + $0x68] sm:$0xf0]  ;;  %v1660_v55 = vld [vmem:[#allocation5 + $0xe4] sm:$0xf]  ;;  %v1545_v58 = vor.u32 %v1711_v46, %v1544_v45 }
  0x2b   :  { %808 = vmatpush.bf16.msra.mxu1 %v1305_v21  ;;  %v1346_v56 = vld [vmem:[#allocation5 + $0xe8] sm:$0xf0]  ;;  %v1609_v59 = vor.u32 %v1727_v50, %v1608_v47  ;;  %v1285_v60 = vor.u32 %v1644_v51, %v1282_v52  ;;  %v1536_v61 = vld [vmem:[#allocation5 + $0x260] sm:$0xf]  ;;  %v1709_v62 = vld [vmem:[#allocation5 + $0x264] sm:$0xf0] }
  0x2c   :  { %836 = vmatpush.bf16.msra.mxu2 %v1369_v22  ;;  %v1600_v63 = vld [vmem:[#allocation5 + $0x2e0] sm:$0xf]  ;;  %v1349_v0 = vor.u32 %v1660_v55, %v1346_v56  ;;  %v1725_v1 = vld [vmem:[#allocation5 + $0x2e4] sm:$0xf0]  ;;  %v1642_v2 = vld [vmem:[#allocation5 + $0x54] sm:$0xf]  ;;  %v1537_v6 = vor.u32 %v1709_v62, %v1536_v61 }
  0x2d   :  { %864 = vmatpush.bf16.msra.mxu3 %v1433_v26  ;;  %v1274_v3 = vld [vmem:[#allocation5 + $0x58] sm:$0xf0]  ;;  %v1658_v4 = vld [vmem:[#allocation5 + $0xd4] sm:$0xf]  ;;  %v1601_v7 = vor.u32 %v1725_v1, %v1600_v63  ;;  %v1528_v9 = vld [vmem:[#allocation5 + $0x250] sm:$0xf] }
  0x2e   :  { %781 = vmatpush.bf16.msra.mxu0 %v1233_v34  ;;  %v1338_v5 = vld [vmem:[#allocation5 + $0xd8] sm:$0xf0]  ;;  %v1277_v8 = vor.u32 %v1642_v2, %v1274_v3  ;;  %v1707_v10 = vld [vmem:[#allocation5 + $0x254] sm:$0xf0]  ;;  %v1592_v11 = vld [vmem:[#allocation5 + $0x2d0] sm:$0xf] }
  0x2f   :  { %809 = vmatpush.bf16.msra.mxu1 %v1297_v38  ;;  %v1341_v12 = vor.u32 %v1658_v4, %v1338_v5  ;;  %v1723_v13 = vld [vmem:[#allocation5 + $0x2d4] sm:$0xf0]  ;;  %v1640_v14 = vld [vmem:[#allocation5 + $0x44] sm:$0xf]  ;;  %v1266_v15 = vld [vmem:[#allocation5 + $0x48] sm:$0xf0]  ;;  %v1529_v18 = vor.u32 %v1707_v10, %v1528_v9 }
  0x30   :  { %837 = vmatpush.bf16.msra.mxu2 %v1361_v39  ;;  %v1656_v16 = vld [vmem:[#allocation5 + $0xc4] sm:$0xf]  ;;  %v1330_v17 = vld [vmem:[#allocation5 + $0xc8] sm:$0xf0]  ;;  %v1184_v19 = vld [vmem:[#allocation2 + $0x30] sm:$0xf]  ;;  %v1593_v21 = vor.u32 %v1723_v13, %v1592_v11  ;;  %v1269_v22 = vor.u32 %v1640_v14, %v1266_v15 }
  0x31   :  { %865 = vmatpush.bf16.msra.mxu3 %v1425_v43  ;;  %782 = vmatmul.bf16.vlgmr.msra.gmra.mxu0 %v1878_v48  ;;  %v1623_v20 = vld [vmem:[#allocation2 + $0x44] sm:$0xf0]  ;;  %v1705_v24 = vld [vmem:[#allocation5 + $0x244] sm:$0xf0]  ;;  %v1620_v26 = vld [vmem:[#allocation2 + $0x34] sm:$0xf]  ;;  %v1333_v28 = vor.u32 %v1656_v16, %v1330_v17 }
  0x32   :  { %810 = vmatmul.bf16.vlgmr.msra.gmra.mxu1 %v1880_v53  ;;  %886 = vmatpush.bf16.msrb.mxu0 %v1545_v58  ;;  %v1520_v23 = vld [vmem:[#allocation5 + $0x240] sm:$0xf]  ;;  %v1186_v27 = vld [vmem:[#allocation2 + $0x48] sm:$0xf0]  ;;  %v1721_v29 = vld [vmem:[#allocation5 + $0x2c4] sm:$0xf0] }
  0x33   :  { %838 = vmatmul.bf16.vlgmr.msra.gmra.mxu2 %v1882_v54  ;;  %914 = vmatpush.bf16.msrb.mxu1 %v1609_v59  ;;  %v1584_v25 = vld [vmem:[#allocation5 + $0x2c0] sm:$0xf]  ;;  %v1638_v30 = vld [vmem:[#allocation5 + $0x34] sm:$0xf]  ;;  %v1258_v31 = vld [vmem:[#allocation5 + $0x38] sm:$0xf0]  ;;  %v1521_v38 = vor.u32 %v1705_v24, %v1520_v23  ;;  %v1892_v50 = vor.u32 %v1620_v26, %v1186_v27 }
  0x34   :  { %942 = vmatpush.bf16.msrb.mxu2 %v1293_v44  ;;  %866 = vmatmul.bf16.vlgmr.msra.gmra.mxu3 %v1884_v57  ;;  %v1192_v32 = vld [vmem:[#allocation2 + $0x38] sm:$0xf]  ;;  %v1654_v33 = vld [vmem:[#allocation5 + $0xb4] sm:$0xf]  ;;  %v1322_v34 = vld [vmem:[#allocation5 + $0xb8] sm:$0xf0]  ;;  %v1585_v39 = vor.u32 %v1721_v29, %v1584_v25  ;;  %v1261_v40 = vor.u32 %v1638_v30, %v1258_v31  ;;  %v1890_v44 = vor.u32 %v1623_v20, %v1184_v19 }
  0x35   :  { %970 = vmatpush.bf16.msrb.mxu3 %v1357_v49  ;;  %v1624_v35 = vld [vmem:[#allocation2 + $0x4c] sm:$0xf0]  ;;  %v1621_v36 = vld [vmem:[#allocation2 + $0x3c] sm:$0xf]  ;;  %v1194_v37 = vld [vmem:[#allocation2 + $0x50] sm:$0xf0]  ;;  %v1325_v45 = vor.u32 %v1654_v33, %v1322_v34 }
  0x36   :  { %887 = vmatpush.bf16.msrb.mxu0 %v1537_v6  ;;  %v1512_v41 = vld [vmem:[#allocation5 + $0x230] sm:$0xf]  ;;  %v1703_v42 = vld [vmem:[#allocation5 + $0x234] sm:$0xf0]  ;;  %v1636_v47 = vld [vmem:[#allocation5 + $0x24] sm:$0xf]  ;;  %v1894_v51 = vor.u32 %v1624_v35, %v1192_v32  ;;  %v1896_v56 = vor.u32 %v1621_v36, %v1194_v37 }
  0x37   :  { %915 = vmatpush.bf16.msrb.mxu1 %v1601_v7  ;;  %v1576_v43 = vld [vmem:[#allocation5 + $0x2b0] sm:$0xf]  ;;  %v1719_v46 = vld [vmem:[#allocation5 + $0x2b4] sm:$0xf0]  ;;  %v1250_v49 = vld [vmem:[#allocation5 + $0x28] sm:$0xf0]  ;;  %v1513_v58 = vor.u32 %v1703_v42, %v1512_v41 }
  0x38   :  { %943 = vmatpush.bf16.msrb.mxu2 %v1285_v60  ;;  %v1652_v52 = vld [vmem:[#allocation5 + $0xa4] sm:$0xf]  ;;  %v1314_v55 = vld [vmem:[#allocation5 + $0xa8] sm:$0xf0]  ;;  %v1577_v59 = vor.u32 %v1719_v46, %v1576_v43  ;;  %v1253_v60 = vor.u32 %v1636_v47, %v1250_v49  ;;  %v1504_v61 = vld [vmem:[#allocation5 + $0x220] sm:$0xf] }
  0x39   :  { %971 = vmatpush.bf16.msrb.mxu3 %v1349_v0  ;;  %v1701_v62 = vld [vmem:[#allocation5 + $0x224] sm:$0xf0]  ;;  %v1317_v63 = vor.u32 %v1652_v52, %v1314_v55  ;;  %v1568_v0 = vld [vmem:[#allocation5 + $0x2a0] sm:$0xf]  ;;  %v1634_v3 = vld [vmem:[#allocation5 + $0x14] sm:$0xf] }
  0x3a   :  { %888 = vmatpush.bf16.msrb.mxu0 %v1529_v18  ;;  %v1717_v1 = vld [vmem:[#allocation5 + $0x2a4] sm:$0xf0]  ;;  %v1505_v2 = vor.u32 %v1701_v62, %v1504_v61  ;;  %v1242_v4 = vld [vmem:[#allocation5 + $0x18] sm:$0xf0]  ;;  %v1496_v5 = vld [vmem:[#allocation5 + $0x210] sm:$0xf] }
  0x3b   :  { %916 = vmatpush.bf16.msrb.mxu1 %v1593_v21  ;;  %v1569_v6 = vor.u32 %v1717_v1, %v1568_v0  ;;  %v1245_v7 = vor.u32 %v1634_v3, %v1242_v4  ;;  %v1650_v9 = vld [vmem:[#allocation5 + $0x94] sm:$0xf]  ;;  %v1306_v10 = vld [vmem:[#allocation5 + $0x98] sm:$0xf0]  ;;  %v1715_v13 = vld [vmem:[#allocation5 + $0x294] sm:$0xf0] }
  0x3c   :  { %944 = vmatpush.bf16.msrb.mxu2 %v1277_v8  ;;  %v1699_v8 = vld [vmem:[#allocation5 + $0x214] sm:$0xf0]  ;;  %v1309_v11 = vor.u32 %v1650_v9, %v1306_v10  ;;  %v1632_v14 = vld [vmem:[#allocation5 + $0x4] sm:$0xf]  ;;  %v1234_v15 = vld [vmem:[#allocation5 + $0x8] sm:$0xf0] }
  0x3d   :  { %972 = vmatpush.bf16.msrb.mxu3 %v1341_v12  ;;  %v1560_v12 = vld [vmem:[#allocation5 + $0x290] sm:$0xf]  ;;  %v1497_v16 = vor.u32 %v1699_v8, %v1496_v5  ;;  %v1648_v17 = vld [vmem:[#allocation5 + $0x84] sm:$0xf]  ;;  %v1298_v18 = vld [vmem:[#allocation5 + $0x88] sm:$0xf0]  ;;  %v1237_v20 = vor.u32 %v1632_v14, %v1234_v15 }
  0x3e   :  { %889 = vmatpush.bf16.msrb.mxu0 %v1521_v38  ;;  %v1561_v19 = vor.u32 %v1715_v13, %v1560_v12  ;;  %v1488_v21 = vld [vmem:[#allocation5 + $0x200] sm:$0xf]  ;;  %v1301_v23 = vor.u32 %v1648_v17, %v1298_v18  ;;  %v1713_v25 = vld [vmem:[#allocation5 + $0x284] sm:$0xf0]  ;;  %v1208_v26 = vld [vmem:[#allocation2 + $0x60] sm:$0xf] }
  0x3f   :  { %917 = vmatpush.bf16.msrb.mxu1 %v1585_v39  ;;  %v1552_v24 = vld [vmem:[#allocation5 + $0x280] sm:$0xf]  ;;  %v1629_v27 = vld [vmem:[#allocation2 + $0x74] sm:$0xf0]  ;;  %v1210_v29 = vld [vmem:[#allocation2 + $0x78] sm:$0xf0] }
  0x40   :  { %945 = vmatpush.bf16.msrb.mxu2 %v1269_v22  ;;  %v1697_v22 = vld [vmem:[#allocation5 + $0x204] sm:$0xf0]  ;;  %v1216_v30 = vld [vmem:[#allocation2 + $0x68] sm:$0xf]  ;;  %v1630_v31 = vld [vmem:[#allocation2 + $0x7c] sm:$0xf0]  ;;  %v1553_v35 = vor.u32 %v1713_v25, %v1552_v24  ;;  %v1902_v36 = vor.u32 %v1629_v27, %v1208_v26 }
  0x41   :  { %973 = vmatpush.bf16.msrb.mxu3 %v1333_v28  ;;  %787 = vmatmul.bf16.gmra.mxu0 %v1890_v44  ;;  %v1626_v28 = vld [vmem:[#allocation2 + $0x64] sm:$0xf]  ;;  %v1489_v32 = vor.u32 %v1697_v22, %v1488_v21  ;;  %v1627_v33 = vld [vmem:[#allocation2 + $0x6c] sm:$0xf]  ;;  %v1906_v38 = vor.u32 %v1630_v31, %v1216_v30  ;;  %v1678_v42 = vld [vmem:[#allocation5 + $0x174] sm:$0xf] }
  0x42   :  { %815 = vmatmul.bf16.gmra.mxu1 %v1892_v50  ;;  %890 = vmatpush.bf16.msrb.mxu0 %v1513_v58  ;;  %v1218_v34 = vld [vmem:[#allocation2 + $0x80] sm:$0xf0]  ;;  %v1904_v37 = vor.u32 %v1626_v28, %v1210_v29  ;;  %v78_v43 = vld [vmem:[#allocation2 + $0x90] sm:$0xff]  ;;  %v1726_v47 = vld [vmem:[#allocation5 + $0x2f4] sm:$0xf]  ;;  %s1845_s2 = smov [#allocation8]  }
  0x43   :  { %843 = vmatmul.bf16.gmra.mxu2 %v1894_v51  ;;  %918 = vmatpush.bf16.msrb.mxu1 %v1577_v59  ;;  %v1908_v39 = vor.u32 %v1627_v33, %v1218_v34  ;;  %v1546_v41 = vld [vmem:[#allocation5 + $0x278] sm:$0xf0]  ;;  %v79_v52 = vld [vmem:[#allocation2 + $0x98] sm:$0xff]  ;;  %v1708_v61 = vld [vmem:[#allocation5 + $0x264] sm:$0xf]  ;;  %v240_v9 = vunpack.c.l.b16 %v78_v43  ;;  %s1142_s29 = sshll.u32 %s1845_s2, 4  ;;  %s1143_s29 = int_to_ptr.vmem [resolvable:$true] %s1142_s29 }
  0x44   :  { %946 = vmatpush.bf16.msrb.mxu2 %v1261_v40  ;;  %871 = vmatmul.bf16.gmra.mxu3 %v1896_v56  ;;  %v1710_v40 = vld [vmem:[#allocation5 + $0x274] sm:$0xf]  ;;  %v1418_v46 = vld [vmem:[#allocation5 + $0x178] sm:$0xf0]  ;;  %v1676_v0 = vld [vmem:[#allocation5 + $0x164] sm:$0xf]  ;;  %v242_v12 = vunpack.c.l.b16 %v79_v52  ;;  %v243_v13 = vunpack.c.h.b16 %v79_v52 }
  0x45   :  { %974 = vmatpush.bf16.msrb.mxu3 %v1325_v45  ;;  %v1549_v45 = vor.u32 %v1710_v40, %v1546_v41  ;;  %v1610_v49 = vld [vmem:[#allocation5 + $0x2f8] sm:$0xf0]  ;;  %v1421_v55 = vor.u32 %v1678_v42, %v1418_v46  ;;  %v1694_v59 = vld [vmem:[#allocation5 + $0x1f4] sm:$0xf]  ;;  %v1410_v1 = vld [vmem:[#allocation5 + $0x168] sm:$0xf0]  ;;  %v1914_v14 = vpack.c.b16 %v240_v9, %v240_v9 }
  0x46   :  { %891 = vmatpush.bf16.msrb.mxu0 %v1505_v2  ;;  %v1613_v58 = vor.u32 %v1726_v47, %v1610_v49  ;;  %v1413_v3 = vor.u32 %v1676_v0, %v1410_v1  ;;  %v1724_v4 = vld [vmem:[#allocation5 + $0x2e4] sm:$0xf]  ;;  %v1602_v5 = vld [vmem:[#allocation5 + $0x2e8] sm:$0xf0]  ;;  %v1920_v17 = vpack.c.b16 %v243_v13, %v243_v13  ;;  %v1706_v18 = vld [vmem:[#allocation5 + $0x254] sm:$0xf] }
  0x47   :  { %919 = vmatpush.bf16.msrb.mxu1 %v1569_v6  ;;  %v1692_v6 = vld [vmem:[#allocation5 + $0x1e4] sm:$0xf]  ;;  %v1474_v8 = vld [vmem:[#allocation5 + $0x1e8] sm:$0xf0]  ;;  %v1402_v22 = vld [vmem:[#allocation5 + $0x158] sm:$0xf0] }
  0x48   :  { %947 = vmatpush.bf16.msrb.mxu2 %v1253_v60  ;;  %v1482_v60 = vld [vmem:[#allocation5 + $0x1f8] sm:$0xf0]  ;;  %v1477_v10 = vor.u32 %v1692_v6, %v1474_v8  ;;  %v1690_v27 = vld [vmem:[#allocation5 + $0x1d4] sm:$0xf]  ;;  %v1704_v29 = vld [vmem:[#allocation5 + $0x244] sm:$0xf] }
  0x49   :  { %975 = vmatpush.bf16.msrb.mxu3 %v1317_v63  ;;  %v1485_v62 = vor.u32 %v1694_v59, %v1482_v60  ;;  %v1538_v63 = vld [vmem:[#allocation5 + $0x268] sm:$0xf0]  ;;  %v1594_v24 = vld [vmem:[#allocation5 + $0x2d8] sm:$0xf0]  ;;  %v1720_v40 = vld [vmem:[#allocation5 + $0x2c4] sm:$0xf] }
  0x4a   :  { %892 = vmatpush.bf16.msrb.mxu0 %v1497_v16  ;;  %v1541_v2 = vor.u32 %v1708_v61, %v1538_v63  ;;  %v1918_v16 = vpack.c.b16 %v242_v12, %v242_v12  ;;  %v1466_v28 = vld [vmem:[#allocation5 + $0x1d8] sm:$0xf0]  ;;  %v1522_v31 = vld [vmem:[#allocation5 + $0x248] sm:$0xf0]  ;;  %v1688_v42 = vld [vmem:[#allocation5 + $0x1c4] sm:$0xf] }
  0x4b   :  { %920 = vmatpush.bf16.msrb.mxu1 %v1561_v19  ;;  %v1530_v19 = vld [vmem:[#allocation5 + $0x258] sm:$0xf0]  ;;  %v1469_v30 = vor.u32 %v1690_v27, %v1466_v28  ;;  %v1394_v33 = vld [vmem:[#allocation5 + $0x148] sm:$0xf0]  ;;  %v1525_v34 = vor.u32 %v1704_v29, %v1522_v31  ;;  %v1176_v47 = vld [vmem:[#allocation2 + $0x10] sm:$0xf] }
  0x4c   :  { %948 = vmatpush.bf16.msrb.mxu2 %v1245_v7  ;;  %v1605_v7 = vor.u32 %v1724_v4, %v1602_v5  ;;  %v1533_v21 = vor.u32 %v1706_v18, %v1530_v19  ;;  %v1586_v41 = vld [vmem:[#allocation5 + $0x2c8] sm:$0xf0]  ;;  %v1619_v49 = vld [vmem:[#allocation2 + $0x24] sm:$0xf0]  ;;  %v1702_v60 = vld [vmem:[#allocation5 + $0x234] sm:$0xf] }
  0x4d   :  { %976 = vmatpush.bf16.msrb.mxu3 %v1309_v11  ;;  %v241_v11 = vunpack.c.h.b16 %v78_v43  ;;  %v1589_v43 = vor.u32 %v1720_v40, %v1586_v41  ;;  %v1616_v52 = vld [vmem:[#allocation2 + $0x14] sm:$0xf]  ;;  %v1514_v61 = vld [vmem:[#allocation5 + $0x238] sm:$0xf0]  ;;  %v1718_v1 = vld [vmem:[#allocation5 + $0x2b4] sm:$0xf] }
  0x4e   :  { %893 = vmatpush.bf16.msrb.mxu0 %v1489_v32  ;;  %v1672_v32 = vld [vmem:[#allocation5 + $0x144] sm:$0xf]  ;;  %v1517_v63 = vor.u32 %v1702_v60, %v1514_v61  ;;  %v1386_v0 = vld [vmem:[#allocation5 + $0x138] sm:$0xf0]  ;;  %v1686_v5 = vld [vmem:[#allocation5 + $0x1b4] sm:$0xf] }
  0x4f   :  { %921 = vmatpush.bf16.msrb.mxu1 %v1553_v35  ;;  %v1916_v15 = vpack.c.b16 %v241_v11, %v241_v11  ;;  %v1397_v35 = vor.u32 %v1672_v32, %v1394_v33  ;;  %v1450_v6 = vld [vmem:[#allocation5 + $0x1b8] sm:$0xf0]  ;;  %v1506_v9 = vld [vmem:[#allocation5 + $0x228] sm:$0xf0]  ;;  %v1716_v12 = vld [vmem:[#allocation5 + $0x2a4] sm:$0xf] }
  0x50   :  { %949 = vmatpush.bf16.msrb.mxu2 %v1237_v20  ;;  %v1674_v20 = vld [vmem:[#allocation5 + $0x154] sm:$0xf]  ;;  %v1453_v8 = vor.u32 %v1686_v5, %v1450_v6  ;;  %v1378_v11 = vld [vmem:[#allocation5 + $0x128] sm:$0xf0]  ;;  %v1684_v18 = vld [vmem:[#allocation5 + $0x1a4] sm:$0xf] }
  0x51   :  { %977 = vmatpush.bf16.msrb.mxu3 %v1301_v23  ;;  %792 = vmatmul.bf16.gmra.mxu0 %v1902_v36  ;;  %v1722_v23 = vld [vmem:[#allocation5 + $0x2d4] sm:$0xf]  ;;  %v1405_v25 = vor.u32 %v1674_v20, %v1402_v22  ;;  %v1570_v13 = vld [vmem:[#allocation5 + $0x2a8] sm:$0xf0]  ;;  %v1200_v22 = vld [vmem:[#allocation2 + $0x40] sm:$0xf] }
  0x52   :  { %820 = vmatmul.bf16.gmra.mxu1 %v1904_v37  ;;  %998 = vmatpush.bf16.msra.mxu0 %v1421_v55  ;;  %v1597_v26 = vor.u32 %v1722_v23, %v1594_v24  ;;  %v1178_v55 = vld [vmem:[#allocation2 + $0x28] sm:$0xf0]  ;;  %v1573_v19 = vor.u32 %v1716_v12, %v1570_v13  ;;  %v1442_v20 = vld [vmem:[#allocation5 + $0x1a8] sm:$0xf0]  ;;  %v1625_v23 = vld [vmem:[#allocation2 + $0x54] sm:$0xf0] }
  0x53   :  { %848 = vmatmul.bf16.gmra.mxu2 %v1906_v38  ;;  %1026 = vmatpush.bf16.msra.mxu1 %v1485_v62  ;;  %v1928_v59 = vor.u32 %v1616_v52, %v1178_v55  ;;  %v1670_v62 = vld [vmem:[#allocation5 + $0x134] sm:$0xf]  ;;  %v1622_v24 = vld [vmem:[#allocation2 + $0x44] sm:$0xf]  ;;  %v1712_v52 = vld [vmem:[#allocation5 + $0x284] sm:$0xf] }
  0x54   :  { %876 = vmatmul.bf16.gmra.mxu3 %v1908_v39  ;;  %1054 = vmatpush.bf16.msra.mxu2 %v1549_v45  ;;  %v1458_v45 = vld [vmem:[#allocation5 + $0x1c8] sm:$0xf0]  ;;  %v1698_v28 = vld [vmem:[#allocation5 + $0x214] sm:$0xf]  ;;  %v1498_v29 = vld [vmem:[#allocation5 + $0x218] sm:$0xf0] }
  0x55   :  { %1082 = vmatpush.bf16.msra.mxu3 %v1613_v58  ;;  %v1461_v46 = vor.u32 %v1688_v42, %v1458_v45  ;;  %v1926_v58 = vor.u32 %v1619_v49, %v1176_v47  ;;  %v1501_v31 = vor.u32 %v1698_v28, %v1498_v29  ;;  %v1370_v32 = vld [vmem:[#allocation5 + $0x118] sm:$0xf0]  ;;  %v1714_v33 = vld [vmem:[#allocation5 + $0x294] sm:$0xf]  ;;  %v1664_v47 = vld [vmem:[#allocation5 + $0x104] sm:$0xf] }
  0x56   :  { %999 = vmatpush.bf16.msra.mxu0 %v1413_v3  ;;  %v1389_v3 = vor.u32 %v1670_v62, %v1386_v0  ;;  %v1682_v41 = vld [vmem:[#allocation5 + $0x194] sm:$0xf]  ;;  %v1434_v42 = vld [vmem:[#allocation5 + $0x198] sm:$0xf0]  ;;  %v1362_v49 = vld [vmem:[#allocation5 + $0x108] sm:$0xf0] }
  0x57   :  { %1027 = vmatpush.bf16.msra.mxu1 %v1477_v10  ;;  %v1668_v10 = vld [vmem:[#allocation5 + $0x124] sm:$0xf]  ;;  %v1437_v45 = vor.u32 %v1682_v41, %v1434_v42  ;;  %v1554_v55 = vld [vmem:[#allocation5 + $0x288] sm:$0xf0]  ;;  %v1224_v0 = vld [vmem:[#allocation2 + $0x70] sm:$0xf] }
  0x58   :  { %1055 = vmatpush.bf16.msra.mxu2 %v1541_v2  ;;  %v1578_v2 = vld [vmem:[#allocation5 + $0x2b8] sm:$0xf0]  ;;  %v1680_v60 = vld [vmem:[#allocation5 + $0x184] sm:$0xf]  ;;  %v1557_v61 = vor.u32 %v1712_v52, %v1554_v55  ;;  %v1426_v62 = vld [vmem:[#allocation5 + $0x188] sm:$0xf0] }
  0x59   :  { %1083 = vmatpush.bf16.msra.mxu3 %v1605_v7  ;;  %v1581_v4 = vor.u32 %v1718_v1, %v1578_v2  ;;  %v1700_v7 = vld [vmem:[#allocation5 + $0x224] sm:$0xf]  ;;  %v1631_v1 = vld [vmem:[#allocation2 + $0x84] sm:$0xf0]  ;;  %v1628_v2 = vld [vmem:[#allocation2 + $0x74] sm:$0xf] }
  0x5a   :  { %1000 = vmatpush.bf16.msra.mxu0 %v1405_v25  ;;  %v1202_v25 = vld [vmem:[#allocation2 + $0x58] sm:$0xf0]  ;;  %v80_v6 = vld [vmem:[#allocation2 + $0xa0] sm:$0xff]  ;;  %s1144_s5 = sshll.u32 %s2030_s3, 4  ;;  %s1145_s5 = int_to_ptr.hbm [resolvable:$true] %s1144_s5 }
  0x5b   :  { %1028 = vmatpush.bf16.msra.mxu1 %v1469_v30  ;;  %v1936_v27 = vor.u32 %v1622_v24, %v1202_v25  ;;  %v1666_v30 = vld [vmem:[#allocation5 + $0x114] sm:$0xf] }
  0x5c   :  { %1056 = vmatpush.bf16.msra.mxu2 %v1533_v21  ;;  %v1445_v21 = vor.u32 %v1684_v18, %v1442_v20 }
  0x5d   :  { %1084 = vmatpush.bf16.msra.mxu3 %v1597_v26  ;;  %v1934_v26 = vor.u32 %v1625_v23, %v1200_v22 }
  0x5e   :  { %1001 = vmatpush.bf16.msra.mxu0 %v1397_v35  ;;  %v1373_v35 = vor.u32 %v1666_v30, %v1370_v32 }
  0x5f   :  { %1029 = vmatpush.bf16.msra.mxu1 %v1461_v46  ;;  %v1490_v46 = vld [vmem:[#allocation5 + $0x208] sm:$0xf0] }
  0x60   :  { %1057 = vmatpush.bf16.msra.mxu2 %v1525_v34  ;;  %v1562_v34 = vld [vmem:[#allocation5 + $0x298] sm:$0xf0] }
  0x61   :  { %797 = vmatmul.bf16.gmra.mxu0 %v1914_v14  ;;  %1085 = vmatpush.bf16.msra.mxu3 %v1589_v43  ;;  %v1565_v40 = vor.u32 %v1714_v33, %v1562_v34  ;;  %v1696_v43 = vld [vmem:[#allocation5 + $0x204] sm:$0xf] }
  0x62   :  { %825 = vmatmul.bf16.gmra.mxu1 %v1916_v15  ;;  %1002 = vmatpush.bf16.msra.mxu0 %v1389_v3  ;;  %v1226_v3 = vld [vmem:[#allocation2 + $0x88] sm:$0xf0] }
  0x63   :  { %853 = vmatmul.bf16.gmra.mxu2 %v1918_v16  ;;  %1030 = vmatpush.bf16.msra.mxu1 %v1453_v8  ;;  %v1229_v5 = vor.u32 %v1628_v2, %v1226_v3  ;;  %v245_v8 = vunpack.c.h.b16 %v80_v6 }
  0x64   :  { %881 = vmatmul.bf16.gmra.mxu3 %v1920_v17  ;;  %1058 = vmatpush.bf16.msra.mxu2 %v1517_v63  ;;  %v1429_v63 = vor.u32 %v1680_v60, %v1426_v62 }
  0x65   :  { %1086 = vmatpush.bf16.msra.mxu3 %v1581_v4  ;;  %v1225_v4 = vor.u32 %v1631_v1, %v1224_v0 }
  0x67   :  { %1031 = vmatpush.bf16.msra.mxu1 %v1445_v21 }
  0x69   :  { %1087 = vmatpush.bf16.msra.mxu3 %v1573_v19 }
  0x6b   :  { %1032 = vmatpush.bf16.msra.mxu1 %v1437_v45 }
  0x6d   :  { %1088 = vmatpush.bf16.msra.mxu3 %v1565_v40 }
  0x6f   :  { %1033 = vmatpush.bf16.msra.mxu1 %v1429_v63 }
  0x71   :  { %894 = vmatmul.bf16.vlgmr.msrb.gmra.mxu0 %v1926_v58  ;;  %1089 = vmatpush.bf16.msra.mxu3 %v1557_v61 }
  0x72   :  { %922 = vmatmul.bf16.vlgmr.msrb.gmra.mxu1 %v1928_v59 }
  0x73   :  { %950 = vmatmul.bf16.vlgmr.msrb.gmra.mxu2 %v1878_v48  ;;  %v1509_v48 = vor.u32 %v1700_v7, %v1506_v9  ;;  %v244_v7 = vunpack.c.l.b16 %v80_v6 }
  0x74   :  { %978 = vmatmul.bf16.vlgmr.msrb.gmra.mxu3 %v1880_v53  ;;  %v1381_v53 = vor.u32 %v1668_v10, %v1378_v11  ;;  %v1946_v10 = vpack.c.b16 %v245_v8, %v245_v8  ;;  %v1952_v11 = vld [vmem:[#allocation7] sm:$0x3] }
  0x75   :  { %1059 = vmatpush.bf16.msra.mxu2 %v1509_v48  ;;  %v1944_v9 = vpack.c.b16 %v244_v7, %v244_v7 }
  0x76   :  { %1003 = vmatpush.bf16.msra.mxu0 %v1381_v53 }
  0x79   :  { %1060 = vmatpush.bf16.msra.mxu2 %v1501_v31 }
  0x7a   :  { %1004 = vmatpush.bf16.msra.mxu0 %v1373_v35 }
  0x81   :  { %899 = vmatmul.bf16.gmra.mxu0 %v1934_v26 }
  0x82   :  { %927 = vmatmul.bf16.gmra.mxu1 %v1936_v27 }
  0x83   :  { %955 = vmatmul.bf16.gmra.mxu2 %v1890_v44  ;;  %v1493_v44 = vor.u32 %v1696_v43, %v1490_v46 }
  0x84   :  { %983 = vmatmul.bf16.gmra.mxu3 %v1892_v50  ;;  %v1365_v50 = vor.u32 %v1664_v47, %v1362_v49 }
  0x85   :  { %1061 = vmatpush.bf16.msra.mxu2 %v1493_v44 }
  0x86   :  { %1005 = vmatpush.bf16.msra.mxu0 %v1365_v50 }
  0x91   :  { %904 = vmatmul.bf16.gmra.mxu0 %v1225_v4 }
  0x92   :  { %932 = vmatmul.bf16.gmra.mxu1 %v1229_v5 }
  0x93   :  { %960 = vmatmul.bf16.gmra.mxu2 %v1902_v36  ;;  %v179_v36 = vperm.slane %v1952_v11, 0 }
  0x94   :  { %988 = vmatmul.bf16.gmra.mxu3 %v1904_v37 }
  0xa1   :  { %909 = vmatmul.bf16.gmra.mxu0 %v1944_v9 }
  0xa2   :  { %937 = vmatmul.bf16.gmra.mxu1 %v1946_v10 }
  0xa3   :  { %965 = vmatmul.bf16.gmra.mxu2 %v1914_v14 }
  0xa4   :  { %993 = vmatmul.bf16.gmra.mxu3 %v1916_v15 }
  0xae   :  { %v783_v37 = vpop.f32.mrf.mxu0 }
  0xaf   :  { %v784_v48 = vadd.f32 %v783_v37, %v179_v36  ;;  %v811_v53 = vpop.f32.mrf.mxu1 }
  0xb1   :  { %v812_v12 = vadd.f32 %v811_v53, %v784_v48  ;;  %1006 = vmatmul.bf16.vlgmr.msra.gmra.mxu0 %v1882_v54 }
  0xb2   :  { %1034 = vmatmul.bf16.vlgmr.msra.gmra.mxu1 %v1884_v57 }
  0xb3   :  { %1062 = vmatmul.bf16.vlgmr.msra.gmra.mxu2 %v1926_v58 }
  0xb4   :  { %1090 = vmatmul.bf16.vlgmr.msra.gmra.mxu3 %v1928_v59 }
  0xb6   :  { %v839_v13 = vpop.f32.mrf.mxu2  ;;  %v785_v15 = vpop.f32.mrf.mxu0 }
  0xb7   :  { %v840_v14 = vadd.f32 %v839_v13, %v812_v12  ;;  %v867_v18 = vpop.f32.mrf.mxu3  ;;  %v786_v19 = vadd.f32 %v785_v15, %v179_v36  ;;  %v813_v20 = vpop.f32.mrf.mxu1 }
  0xb9   :  { %v1959_v21 = vadd.f32 %v867_v18, %v840_v14  ;;  %v814_v22 = vadd.f32 %v813_v20, %v786_v19 }
  0xbe   :  { %v841_v23 = vpop.f32.mrf.mxu2  ;;  %v788_v28 = vpop.f32.mrf.mxu0 }
  0xbf   :  { %v842_v24 = vadd.f32 %v841_v23, %v814_v22  ;;  %v869_v25 = vpop.f32.mrf.mxu3  ;;  %v789_v54 = vadd.f32 %v788_v28, %v179_v36  ;;  %v816_v29 = vpop.f32.mrf.mxu1 }
  0xc1   :  { %v870_v57 = vadd.f32 %v869_v25, %v842_v24  ;;  %v817_v30 = vadd.f32 %v816_v29, %v789_v54  ;;  %1011 = vmatmul.bf16.gmra.mxu0 %v1894_v51 }
  0xc2   :  { %1039 = vmatmul.bf16.gmra.mxu1 %v1896_v56 }
  0xc3   :  { %1067 = vmatmul.bf16.gmra.mxu2 %v1934_v26 }
  0xc4   :  { %1095 = vmatmul.bf16.gmra.mxu3 %v1936_v27 }
  0xc6   :  { %v844_v58 = vpop.f32.mrf.mxu2  ;;  %v790_v32 = vpop.f32.mrf.mxu0 }
  0xc7   :  { %v845_v59 = vadd.f32 %v844_v58, %v817_v30  ;;  %v872_v31 = vpop.f32.mrf.mxu3  ;;  %v791_v33 = vadd.f32 %v790_v32, %v179_v36  ;;  %v818_v34 = vpop.f32.mrf.mxu1 }
  0xc9   :  { %v873_v35 = vadd.f32 %v872_v31, %v845_v59  ;;  %v819_v40 = vadd.f32 %v818_v34, %v791_v33 }
  0xce   :  { %v846_v41 = vpop.f32.mrf.mxu2  ;;  %v793_v45 = vpop.f32.mrf.mxu0 }
  0xcf   :  { %v847_v42 = vadd.f32 %v846_v41, %v819_v40  ;;  %v874_v43 = vpop.f32.mrf.mxu3  ;;  %v794_v46 = vadd.f32 %v793_v45, %v179_v36  ;;  %v821_v51 = vpop.f32.mrf.mxu1 }
  0xd1   :  { %v875_v47 = vadd.f32 %v874_v43, %v847_v42  ;;  %v822_v56 = vadd.f32 %v821_v51, %v794_v46  ;;  %1016 = vmatmul.bf16.gmra.mxu0 %v1906_v38 }
  0xd2   :  { %1044 = vmatmul.bf16.gmra.mxu1 %v1908_v39 }
  0xd3   :  { %1072 = vmatmul.bf16.gmra.mxu2 %v1225_v4 }
  0xd4   :  { %1100 = vmatmul.bf16.gmra.mxu3 %v1229_v5 }
  0xd6   :  { %v849_v26 = vpop.f32.mrf.mxu2  ;;  %v795_v44 = vpop.f32.mrf.mxu0 }
  0xd7   :  { %v850_v27 = vadd.f32 %v849_v26, %v822_v56  ;;  %v877_v49 = vpop.f32.mrf.mxu3  ;;  %v796_v50 = vadd.f32 %v795_v44, %v179_v36  ;;  %v823_v52 = vpop.f32.mrf.mxu1 }
  0xd9   :  { %v878_v55 = vadd.f32 %v877_v49, %v850_v27  ;;  %v824_v60 = vadd.f32 %v823_v52, %v796_v50  ;;  %v1997_v49 = vperm.slane %v1952_v11, 1 }
  0xde   :  { %v851_v61 = vpop.f32.mrf.mxu2  ;;  %v798_v0 = vpop.f32.mrf.mxu0 }
  0xdf   :  { %v852_v62 = vadd.f32 %v851_v61, %v824_v60  ;;  %v879_v63 = vpop.f32.mrf.mxu3  ;;  %v799_v1 = vadd.f32 %v798_v0, %v179_v36  ;;  %v826_v2 = vpop.f32.mrf.mxu1 }
  0xe1   :  { %v880_v3 = vadd.f32 %v879_v63, %v852_v62  ;;  %v827_v38 = vadd.f32 %v826_v2, %v799_v1  ;;  %1021 = vmatmul.bf16.gmra.mxu0 %v1918_v16 }
  0xe2   :  { %1049 = vmatmul.bf16.gmra.mxu1 %v1920_v17 }
  0xe3   :  { %1077 = vmatmul.bf16.gmra.mxu2 %v1944_v9 }
  0xe4   :  { %1105 = vmatmul.bf16.gmra.mxu3 %v1946_v10 }
  0xe6   :  { %v854_v39 = vpop.f32.mrf.mxu2  ;;  %v800_v6 = vpop.f32.mrf.mxu0 }
  0xe7   :  { %v855_v4 = vadd.f32 %v854_v39, %v827_v38  ;;  %v882_v5 = vpop.f32.mrf.mxu3  ;;  %v828_v7 = vpop.f32.mrf.mxu1 }
  0xe9   :  { %v883_v8 = vadd.f32 %v882_v5, %v855_v4 }
  0xee   :  { %v856_v37 = vpop.f32.mrf.mxu2  ;;  %v895_v36 = vpop.f32.mrf.mxu0 }
  0xef   :  { %v884_v48 = vpop.f32.mrf.mxu3  ;;  %v896_v53 = vadd.f32 %v895_v36, %v1959_v21  ;;  %v923_v12 = vpop.f32.mrf.mxu1 }
  0xf1   :  { %v1972_v13 = vadd.f32 %v923_v12, %v896_v53 }
  0xf3   :  { %v1110_v37 = vmax.f32 %v1972_v13, 0.0 }
  0xf6   :  { %v951_v16 = vpop.f32.mrf.mxu2  ;;  %v897_v14 = vpop.f32.mrf.mxu0 }
  0xf7   :  { %v979_v17 = vpop.f32.mrf.mxu3  ;;  %v898_v9 = vadd.f32 %v897_v14, %v870_v57  ;;  %v925_v18 = vpop.f32.mrf.mxu1 }
  0xf9   :  { %v1974_v10 = vadd.f32 %v925_v18, %v898_v9 }
  0xfe   :  { %v953_v15 = vpop.f32.mrf.mxu2  ;;  %v900_v20 = vpop.f32.mrf.mxu0 }
  0xff   :  { %v981_v19 = vpop.f32.mrf.mxu3  ;;  %v901_v22 = vadd.f32 %v900_v20, %v873_v35  ;;  %v928_v23 = vpop.f32.mrf.mxu1  ;;  %v954_v2 = vadd.f32 %v953_v15, %v1997_v49 }
 0x101   :  { %v1976_v24 = vadd.f32 %v928_v23, %v901_v22  ;;  %v982_v39 = vadd.f32 %v981_v19, %v954_v2  ;;  %v1112_v22 = vmax.f32 %v1974_v10, 0.0 }
 0x106   :  { %v956_v25 = vpop.f32.mrf.mxu2  ;;  %v902_v21 = vpop.f32.mrf.mxu0 }
 0x107   :  { %v984_v28 = vpop.f32.mrf.mxu3  ;;  %v903_v54 = vadd.f32 %v902_v21, %v875_v47  ;;  %v930_v29 = vpop.f32.mrf.mxu1  ;;  %v957_v48 = vadd.f32 %v956_v25, %v1997_v49 }
 0x109   :  { %v1978_v30 = vadd.f32 %v930_v29, %v903_v54 }
 0x10e   :  { %v958_v58 = vpop.f32.mrf.mxu2  ;;  %v905_v57 = vpop.f32.mrf.mxu0 }
 0x10f   :  { %v986_v59 = vpop.f32.mrf.mxu3  ;;  %v906_v31 = vadd.f32 %v905_v57, %v878_v55  ;;  %v933_v32 = vpop.f32.mrf.mxu1  ;;  %v952_v55 = vadd.f32 %v951_v16, %v1997_v49  ;;  %v959_v23 = vadd.f32 %v958_v58, %v1997_v49 }
 0x111   :  { %v1980_v33 = vadd.f32 %v933_v32, %v906_v31  ;;  %v980_v61 = vadd.f32 %v979_v17, %v952_v55  ;;  %v985_v17 = vadd.f32 %v984_v28, %v957_v48  ;;  %v987_v29 = vadd.f32 %v986_v59, %v959_v23 }
 0x116   :  { %v1982_v34 = vpop.f32.mrf.mxu2  ;;  %v907_v40 = vpop.f32.mrf.mxu0 }
 0x117   :  { %v1984_v35 = vpop.f32.mrf.mxu3  ;;  %v908_v41 = vadd.f32 %v907_v40, %v880_v3  ;;  %v935_v42 = vpop.f32.mrf.mxu1 }
 0x119   :  { %v1986_v43 = vadd.f32 %v935_v42, %v908_v41  ;;  %v1114_v42 = vmax.f32 %v1976_v24, 0.0 }
 0x11e   :  { %v1988_v45 = vpop.f32.mrf.mxu2  ;;  %v910_v51 = vpop.f32.mrf.mxu0 }
 0x11f   :  { %v1990_v46 = vpop.f32.mrf.mxu3  ;;  %v911_v47 = vadd.f32 %v910_v51, %v883_v8  ;;  %v938_v56 = vpop.f32.mrf.mxu1  ;;  %v962_v51 = vadd.f32 %v1982_v34, %v1997_v49  ;;  %v964_v24 = vadd.f32 %v1988_v45, %v1997_v49 }
 0x121   :  { %v1992_v26 = vadd.f32 %v938_v56, %v911_v47 }
 0x126   :  { %v1994_v27 = vpop.f32.mrf.mxu2  ;;  %v912_v50 = vpop.f32.mrf.mxu0 }
 0x127   :  { %v1999_v44 = vpop.f32.mrf.mxu3  ;;  %v940_v52 = vpop.f32.mrf.mxu1  ;;  %v990_v50 = vadd.f32 %v1984_v35, %v962_v51 }
 0x12e   :  { %v968_v60 = vpop.f32.mrf.mxu2  ;;  %v1007_v63 = vpop.f32.mrf.mxu0 }
 0x12f   :  { %v996_v62 = vpop.f32.mrf.mxu3  ;;  %v1035_v0 = vpop.f32.mrf.mxu1  ;;  %v1008_v1 = vadd.f32 %v1007_v63, %v980_v61  ;;  %v1116_v63 = vmax.f32 %v1978_v30, 0.0  ;;  %v967_v30 = vadd.f32 %v1994_v27, %v1997_v49 }
 0x131   :  { %v1036_v3 = vadd.f32 %v1035_v0, %v1008_v1  ;;  %v995_v48 = vadd.f32 %v1999_v44, %v967_v30  ;;  %v1122_v44 = vmax.f32 %v1992_v26, 0.0 }
 0x136   :  { %v1063_v38 = vpop.f32.mrf.mxu2  ;;  %v1009_v5 = vpop.f32.mrf.mxu0 }
 0x137   :  { %v1064_v4 = vadd.f32 %v1063_v38, %v1036_v3  ;;  %v1091_v11 = vpop.f32.mrf.mxu3  ;;  %v1037_v6 = vpop.f32.mrf.mxu1  ;;  %v1010_v8 = vadd.f32 %v1009_v5, %v982_v39  ;;  %v992_v3 = vadd.f32 %v1990_v46, %v964_v24 }
 0x139   :  { %v1092_v7 = vadd.f32 %v1091_v11, %v1064_v4  ;;  %v1038_v12 = vadd.f32 %v1037_v6, %v1010_v8  ;;  %v1118_v6 = vmax.f32 %v1980_v33, 0.0 }
 0x13b   :  { %v1111_v36 = vmax.f32 %v1092_v7, 0.0 }
 0x13d   :  { %v1124_v53 = vpack.c.bf16 %v1111_v36, %v1110_v37 }
 0x13e   :  { %v1065_v16 = vpop.f32.mrf.mxu2  ;;  %v1012_v18 = vpop.f32.mrf.mxu0 }
 0x13f   :  { %1131 = vst [vmem:[#allocation8] sm:$0xff] %v1124_v53  ;;  %v1066_v14 = vadd.f32 %v1065_v16, %v1038_v12  ;;  %v1093_v9 = vpop.f32.mrf.mxu3  ;;  %v1040_v15 = vpop.f32.mrf.mxu1  ;;  %v1013_v20 = vadd.f32 %v1012_v18, %v985_v17 }
 0x141   :  { %v1094_v19 = vadd.f32 %v1093_v9, %v1066_v14  ;;  %v1041_v54 = vadd.f32 %v1040_v15, %v1013_v20  ;;  %v1120_v14 = vmax.f32 %v1986_v43, 0.0 }
 0x143   :  { %v1113_v21 = vmax.f32 %v1094_v19, 0.0 }
 0x145   :  { %v1125_v13 = vpack.c.bf16 %v1113_v21, %v1112_v22 }
 0x146   :  { %v1068_v25 = vpop.f32.mrf.mxu2  ;;  %v1014_v28 = vpop.f32.mrf.mxu0 }
 0x147   :  { %1132 = vst [vmem:[#allocation8 + $0x8] sm:$0xff] %v1125_v13  ;;  %v1069_v57 = vadd.f32 %v1068_v25, %v1041_v54  ;;  %v1096_v31 = vpop.f32.mrf.mxu3  ;;  %v1042_v32 = vpop.f32.mrf.mxu1  ;;  %v1015_v41 = vadd.f32 %v1014_v28, %v987_v29 }
 0x149   :  { %v1097_v40 = vadd.f32 %v1096_v31, %v1069_v57  ;;  %v1043_v58 = vadd.f32 %v1042_v32, %v1015_v41 }
 0x14b   :  { %v1115_v10 = vmax.f32 %v1097_v40, 0.0 }
 0x14d   :  { %v1126_v47 = vpack.c.bf16 %v1115_v10, %v1114_v42 }
 0x14e   :  { %v1070_v56 = vpop.f32.mrf.mxu2  ;;  %v1017_v55 = vpop.f32.mrf.mxu0 }
 0x14f   :  { %1133 = vst [vmem:[#allocation8 + $0x10] sm:$0xff] %v1126_v47  ;;  %v1071_v59 = vadd.f32 %v1070_v56, %v1043_v58  ;;  %v1098_v52 = vpop.f32.mrf.mxu3  ;;  %v1045_v60 = vpop.f32.mrf.mxu1  ;;  %v1018_v62 = vadd.f32 %v1017_v55, %v990_v50 }
 0x151   :  { %v1099_v61 = vadd.f32 %v1098_v52, %v1071_v59  ;;  %v1046_v1 = vadd.f32 %v1045_v60, %v1018_v62 }
 0x153   :  { %v1117_v0 = vmax.f32 %v1099_v61, 0.0 }
 0x155   :  { %v1127_v34 = vpack.c.bf16 %v1117_v0, %v1116_v63 }
 0x156   :  { %v1073_v2 = vpop.f32.mrf.mxu2  ;;  %v1019_v39 = vpop.f32.mrf.mxu0 }
 0x157   :  { %1134 = vst [vmem:[#allocation8 + $0x18] sm:$0xff] %v1127_v34  ;;  %v1074_v35 = vadd.f32 %v1073_v2, %v1046_v1  ;;  %v1101_v38 = vpop.f32.mrf.mxu3  ;;  %v1047_v4 = vpop.f32.mrf.mxu1  ;;  %v1020_v5 = vadd.f32 %v1019_v39, %v992_v3 }
 0x159   :  { %v1102_v11 = vadd.f32 %v1101_v38, %v1074_v35  ;;  %v1048_v8 = vadd.f32 %v1047_v4, %v1020_v5 }
 0x15b   :  { %v1119_v7 = vmax.f32 %v1102_v11, 0.0 }
 0x15d   :  { %v1128_v45 = vpack.c.bf16 %v1119_v7, %v1118_v6 }
 0x15e   :  { %v1075_v37 = vpop.f32.mrf.mxu2  ;;  %v1022_v53 = vpop.f32.mrf.mxu0 }
 0x15f   :  { %1135 = vst [vmem:[#allocation8 + $0x20] sm:$0xff] %v1128_v45  ;;  %v1076_v46 = vadd.f32 %v1075_v37, %v1048_v8  ;;  %v1103_v36 = vpop.f32.mrf.mxu3  ;;  %v1050_v12 = vpop.f32.mrf.mxu1  ;;  %v1023_v17 = vadd.f32 %v1022_v53, %v995_v48 }
 0x161   :  { %v1104_v16 = vadd.f32 %v1103_v36, %v1076_v46  ;;  %v1051_v18 = vadd.f32 %v1050_v12, %v1023_v17 }
 0x163   :  { %v1121_v9 = vmax.f32 %v1104_v16, 0.0 }
 0x165   :  { %v1129_v33 = vpack.c.bf16 %v1121_v9, %v1120_v14 }
 0x166   :  { %v1078_v15 = vpop.f32.mrf.mxu2  ;;  %v1024_v19 = vpop.f32.mrf.mxu0 }
 0x167   :  { %1136 = vst [vmem:[#allocation8 + $0x28] sm:$0xff] %v1129_v33  ;;  %v1079_v27 = vadd.f32 %v1078_v15, %v1051_v18  ;;  %v1106_v49 = vpop.f32.mrf.mxu3  ;;  %v1052_v20 = vpop.f32.mrf.mxu1 }
 0x169   :  { %v1107_v22 = vadd.f32 %v1106_v49, %v1079_v27 }
 0x16b   :  { %v1123_v23 = vmax.f32 %v1107_v22, 0.0 }
 0x16d   :  { %v1130_v43 = vpack.c.bf16 %v1123_v23, %v1122_v44 }
 0x16e   :  { %v1080_v21 = vpop.f32.mrf.mxu2 }
 0x16f   :  { %1137 = vst [vmem:[#allocation8 + $0x30] sm:$0xff] %v1130_v43  ;;  %v1108_v13 = vpop.f32.mrf.mxu3 }
 0x170   :  { %1150 = dma.vmem_to_hbm [thread:$0]  %s1143_s29, 896, %s1145_s5, [#allocation4], %s1839_s20, %s1839_s20, %s1840_s21  }
 0x171   :  { %1836 = dma.done.wait [#allocation4], 896  }
 0x172   :  { %1837 = vsyncadd [#allocation4], 4294966400 }
 0x173   :  { %1155 = vsyncpa [#allocation3], 1 }
 0x174   :  { %1156 = vsyncpa [#allocation6], 1 }
 0x175   :  { %1157 = vsyncpa [#allocation4], 1 }

</bundles_post_ra>
